<compile_context>
chip_gen: v7x
topology: tpu7x:2x2x1
jax: 0.10.0
libtpu: 0.0.40
codegen_flags: <defaults>
</compile_context>

<pallas_src>
import functools

import jax
import jax.numpy as jnp
from jax.experimental import pallas as pl
from jax.experimental.pallas import tpu as pltpu


# ---------------------------------------------------------------------------
# Fused FFN kernel
# ---------------------------------------------------------------------------

def _ffn_fused_kernel(x_hbm, x_ref, w1_ref, b1_ref, w2_ref, b2_ref, g_ref,
                      bt_ref, o_ref, win_ref, sems, *,
                      tl, L, nt, pad0, pad1, K0, K1, fold1, fold2, eps):
    """One (batch, row-tile) grid step: conv1 + ReLU + conv2 + residual + LayerNorm.

    x_hbm : (B, L, d_in) f32 left in HBM (memory_space=pl.ANY)  -- halo rows only.
    x_ref : (1, tl, d_in) f32 auto-pipelined body tile (copy overlapped by Pallas).
    w1    : (K0*d_in, d_hid) bf16 if fold1 else (K0, d_in, d_hid) bf16.
    w2    : (K1*d_hid, d_in) bf16 if fold2 else (K1, d_hid, d_in) bf16.
    win   : VMEM scratch (tl + 2H, d_in) f32 = [lead halo | body | trail halo].
    """
    b = pl.program_id(0)
    lt = pl.program_id(1)
    H = pad0 + pad1
    d_in = x_ref.shape[-1]
    t0 = lt * tl
    rem = L - (nt - 1) * tl              # static: valid rows in the last tile
    partial = rem != tl                  # static: last tile hangs off the end

    # ---- 1. kick off the tiny halo DMAs (body tile already pipelined) ------
    def lead_copy():
        return pltpu.make_async_copy(x_hbm.at[b, pl.ds(t0 - H, H), :],
                                     win_ref.at[pl.ds(0, H), :], sems.at[0])

    def trail_copy(n):
        return pltpu.make_async_copy(x_hbm.at[b, pl.ds(t0 + tl, n), :],
                                     win_ref.at[pl.ds(H + tl, n), :], sems.at[1])

    if H > 0:
        @pl.when(lt > 0)
        def _():
            lead_copy().start()

        @pl.when(lt == 0)
        def _():
            win_ref[pl.ds(0, H), :] = jnp.zeros((H, d_in), jnp.float32)

        if partial and rem < H:
            # Second-to-last tile cannot fetch a full trailing halo: fetch only the
            # `rem` in-bounds rows and zero the rest (true conv zero-padding).
            @pl.when(lt < nt - 2)
            def _():
                trail_copy(H).start()

            @pl.when(lt == nt - 2)
            def _():
                win_ref[pl.ds(H + tl + rem, H - rem), :] = jnp.zeros(
                    (H - rem, d_in), jnp.float32)
                trail_copy(rem).start()

            @pl.when(lt == nt - 1)
            def _():
                win_ref[pl.ds(H + tl, H), :] = jnp.zeros((H, d_in), jnp.float32)
        else:
            @pl.when(lt < nt - 1)
            def _():
                trail_copy(H).start()

            @pl.when(lt == nt - 1)
            def _():
                win_ref[pl.ds(H + tl, H), :] = jnp.zeros((H, d_in), jnp.float32)

    # ---- 2. body rows; zero rows beyond L for a partial last tile ----------
    xt = x_ref[0]                                        # (tl, d_in) f32
    if partial:
        row_g = t0 + jax.lax.broadcasted_iota(jnp.int32, (tl, 1), 0)
        xt = jnp.where(row_g < L, xt, 0.0)

    # ---- 3. assemble the window, wait for the halos -------------------------
    if H > 0:
        win_ref[pl.ds(H, tl), :] = xt

        @pl.when(lt > 0)
        def _():
            lead_copy().wait()

        if partial and rem < H:
            @pl.when(lt < nt - 2)
            def _():
                trail_copy(H).wait()

            @pl.when(lt == nt - 2)
            def _():
                trail_copy(rem).wait()
        else:
            @pl.when(lt < nt - 1)
            def _():
                trail_copy(H).wait()

        xwb = win_ref[...].astype(jnp.bfloat16)          # (tl + 2H, d_in)
    else:
        xwb = xt.astype(jnp.bfloat16)                    # (tl, d_in)

    # ---- 4. conv1 + bias + ReLU ---------------------------------------------
    L1w = tl + 2 * pad1                  # conv1 output rows that conv2 needs
    if fold1:
        # Single MXU pass: K0 shifted slices concatenated on the lane axis,
        # weights pre-flattened to (K0*d_in, d_hid).
        if K0 == 1:
            lhs1 = xwb[0:L1w, :]
        else:
            lhs1 = jnp.concatenate([xwb[k:k + L1w, :] for k in range(K0)],
                                   axis=-1)              # (L1w, K0*d_in)
        acc1 = jnp.dot(lhs1, w1_ref[...], preferred_element_type=jnp.float32)
    else:
        # Fallback for lane-unaligned d_in: per-tap small-K matmuls.
        acc1 = jnp.dot(xwb[0:L1w, :], w1_ref[0],
                       preferred_element_type=jnp.float32)
        for k in range(1, K0):
            acc1 += jnp.dot(xwb[k:k + L1w, :], w1_ref[k],
                            preferred_element_type=jnp.float32)
    h = jnp.maximum(acc1 + b1_ref[...], 0.0)

    # conv1-output rows outside [0, L) are conv2's ZERO padding (not conv1 of
    # zero-extended x) -> force them to zero.  Global-index mask also covers the
    # ragged tail of a partial tile; the select rides under MXU slack.
    if pad1 > 0:
        j_g = (t0 - pad1) + jax.lax.broadcasted_iota(jnp.int32, (L1w, 1), 0)
        h = jnp.where(jnp.logical_and(j_g >= 0, j_g < L), h, 0.0)

    # ---- 5. conv2 + bias -----------------------------------------------------
    hb = h.astype(jnp.bfloat16)
    if fold2:
        if K1 == 1:
            lhs2 = hb                                    # (tl, d_hid)
        else:
            lhs2 = jnp.concatenate([hb[k:k + tl, :] for k in range(K1)],
                                   axis=-1)              # (tl, K1*d_hid)
        acc2 = jnp.dot(lhs2, w2_ref[...], preferred_element_type=jnp.float32)
    else:
        acc2 = jnp.dot(hb[0:tl, :], w2_ref[0],
                       preferred_element_type=jnp.float32)
        for k in range(1, K1):
            acc2 += jnp.dot(hb[k:k + tl, :], w2_ref[k],
                            preferred_element_type=jnp.float32)
    y = acc2 + b2_ref[...]

    # ---- 6. dropout (identity, inference) + residual + LayerNorm -------------
    z = y + xt
    mu = jnp.mean(z, axis=-1, keepdims=True)
    var = jnp.mean(jnp.square(z - mu), axis=-1, keepdims=True)
    out = (z - mu) * jax.lax.rsqrt(var + eps) * g_ref[...] + bt_ref[...]
    o_ref[0] = out.astype(o_ref.dtype)


# ---------------------------------------------------------------------------
# Wrapper: tiling, VMEM budgeting, parameter preparation
# ---------------------------------------------------------------------------

def prepare_ffn_params(params):
    """One-time (model-load) prep: bf16 weights, im2col-flattened when lane-aligned."""
    w1 = jnp.asarray(params["w1"], jnp.float32)          # (K0, d_in, d_hid)
    w2 = jnp.asarray(params["w2"], jnp.float32)          # (K1, d_hid, d_in)
    K0, d_in, d_hid = w1.shape
    K1 = w2.shape[0]
    fold1 = (K0 == 1) or (d_in % 128 == 0)
    fold2 = (K1 == 1) or (d_hid % 128 == 0)
    w1b = w1.astype(jnp.bfloat16)
    w2b = w2.astype(jnp.bfloat16)
    return {
        "w1": w1b.reshape(K0 * d_in, d_hid) if fold1 else w1b,
        "w2": w2b.reshape(K1 * d_hid, d_in) if fold2 else w2b,
        "b1": jnp.asarray(params["b1"], jnp.float32).reshape(1, d_hid),
        "b2": jnp.asarray(params["b2"], jnp.float32).reshape(1, d_in),
        "ln_g": jnp.asarray(params["ln_g"], jnp.float32).reshape(1, d_in),
        "ln_b": jnp.asarray(params["ln_b"], jnp.float32).reshape(1, d_in),
        "fold1": fold1, "fold2": fold2,
        "K0": K0, "K1": K1, "d_in": d_in, "d_hid": d_hid,
    }


def _round_up(x, m):
    return ((x + m - 1) // m) * m


def _choose_row_tile(L, B, d_in, d_hid, K0, K1, H, *,
                     vmem_budget=28 * 1024 * 1024, max_tile=1024):
    """Largest row tile whose per-step working set stays under `vmem_budget`."""
    per_row = ((2 + 2 + 1 + 4) * d_in * 4        # x/out double-buffers, window, f32 temps
               + K0 * d_in * 2                    # conv1 im2col LHS (bf16)
               + d_hid * 6                        # h (f32) + hb (bf16)
               + K1 * d_hid * 2)                  # conv2 im2col LHS (bf16)
    fixed = (2 * (K0 * d_in * d_hid + K1 * d_hid * d_in) * 2   # weights x 2 buffers
             + 2 * H * d_in * (4 + 2 * K0) + (2 << 20))
    cap = max(8, (vmem_budget - fixed) // per_row)
    cap = min(cap, max_tile)
    if L <= cap:
        tl = L
    else:
        gran = 128 if cap >= 128 else (16 if cap >= 16 else 8)
        tl = max(8, (cap // gran) * gran)
        tl = max(tl, _round_up(max(H, 1), 8))     # tile must cover the conv halo
        if tl >= L:
            tl = L
    # Keep >= 2 grid points for v7x megacore when the batch is tiny.
    if B * pl.cdiv(L, tl) < 2 and L > 16:
        half = _round_up((L + 1) // 2, 8)
        if half < L and half >= max(8, H):
            tl = half
    return int(tl)


def _vmem_bytes_estimate(tl, H, d_in, d_hid, K0, K1, fold1, fold2):
    win = (tl + 2 * H) * d_in * 4
    bufs = 4 * tl * d_in * 4                                  # x body + out, 2 bufs each
    w = 2 * (K0 * d_in * d_hid + K1 * d_hid * d_in) * 2       # weights, 2 bufs
    lhs1 = (tl + 2 * H) * (K0 if fold1 else 1) * d_in * 2
    hbytes = (tl + 2 * H) * d_hid * 6
    lhs2 = tl * (K1 if fold2 else 1) * d_hid * 2
    tmps = 4 * tl * d_in * 4
    return win + bufs + w + lhs1 + hbytes + lhs2 + tmps


def positionwise_feed_forward(x, prepared, *, padding, eps=1e-5, row_tile=None):
    """Fused FFN forward. x: (B, L, d_in) f32 -> (B, L, d_in) f32."""
    B, L, d_in = x.shape
    K0, K1 = prepared["K0"], prepared["K1"]
    d_hid = prepared["d_hid"]
    pad0, pad1 = padding
    assert prepared["d_in"] == d_in
    # residual add requires length preservation; support the standard FastSpeech
    # symmetric "same" convs (K = 2*pad + 1).
    assert K0 == 2 * pad0 + 1 and K1 == 2 * pad1 + 1, \
        "fused kernel supports length-preserving convs (kernel = 2*padding + 1)"
    H = pad0 + pad1
    fold1, fold2 = prepared["fold1"], prepared["fold2"]

    if row_tile is None:
        tl = _choose_row_tile(L, B, d_in, d_hid, K0, K1, H)
    else:
        tl = int(row_tile)
        tl = L if tl >= L else max(8, (tl // 8) * 8)
    nt = pl.cdiv(L, tl)
    if nt > 1:
        assert tl % 8 == 0, "row tile must be a multiple of 8"
        assert tl >= H, "row tile must cover the conv halo (tl >= pad0 + pad1)"

    est = _vmem_bytes_estimate(tl, H, d_in, d_hid, K0, K1, fold1, fold2)
    vmem_limit = int(min(max(2 * est, 32 * 1024 * 1024), 64 * 1024 * 1024))

    w1, w2 = prepared["w1"], prepared["w2"]
    w1_spec = (pl.BlockSpec((K0 * d_in, d_hid), lambda b, t: (0, 0)) if fold1
               else pl.BlockSpec((K0, d_in, d_hid), lambda b, t: (0, 0, 0)))
    w2_spec = (pl.BlockSpec((K1 * d_hid, d_in), lambda b, t: (0, 0)) if fold2
               else pl.BlockSpec((K1, d_hid, d_in), lambda b, t: (0, 0, 0)))

    kern = functools.partial(_ffn_fused_kernel, tl=tl, L=L, nt=nt,
                             pad0=pad0, pad1=pad1, K0=K0, K1=K1,
                             fold1=fold1, fold2=fold2, eps=eps)

    return pl.pallas_call(
        kern,
        grid=(B, nt),
        in_specs=[
            pl.BlockSpec(memory_space=pl.ANY),                       # x in HBM (halos)
            pl.BlockSpec((1, tl, d_in), lambda b, t: (b, t, 0)),     # x body (pipelined)
            w1_spec,                                                 # w1 (resident)
            pl.BlockSpec((1, d_hid), lambda b, t: (0, 0)),           # b1
            w2_spec,                                                 # w2 (resident)
            pl.BlockSpec((1, d_in), lambda b, t: (0, 0)),            # b2
            pl.BlockSpec((1, d_in), lambda b, t: (0, 0)),            # ln gamma
            pl.BlockSpec((1, d_in), lambda b, t: (0, 0)),            # ln beta
        ],
        out_specs=pl.BlockSpec((1, tl, d_in), lambda b, t: (b, t, 0)),
        out_shape=jax.ShapeDtypeStruct((B, L, d_in), jnp.float32),
        scratch_shapes=[
            pltpu.VMEM((tl + 2 * H, d_in), jnp.float32),             # halo window
            pltpu.SemaphoreType.DMA((2,)),
        ],
        compiler_params=pltpu.CompilerParams(
            dimension_semantics=("parallel", "parallel"),
            vmem_limit_bytes=vmem_limit,
        ),
    )(x, x, w1, prepared["b1"], w2, prepared["b2"],
      prepared["ln_g"], prepared["ln_b"])


# ---------------------------------------------------------------------------
# Pure-JAX reference (f32) for verification
# ---------------------------------------------------------------------------

def positionwise_feed_forward_reference(x, params, *, kernel, padding, eps=1e-5):
    K0, K1 = kernel
    pad0, pad1 = padding
    B, L, _ = x.shape
    xp = jnp.pad(x, ((0, 0), (pad0, pad0), (0, 0)))
    L1 = L + 2 * pad0 - K0 + 1
    h = sum(xp[:, k:k + L1, :] @ params["w1"][k] for k in range(K0)) + params["b1"]
    h = jnp.maximum(h, 0.0)
    hp = jnp.pad(h, ((0, 0), (pad1, pad1), (0, 0)))
    L2 = L1 + 2 * pad1 - K1 + 1
    y = sum(hp[:, k:k + L2, :] @ params["w2"][k] for k in range(K1)) + params["b2"]
    z = y + x
    mu = jnp.mean(z, axis=-1, keepdims=True)
    var = jnp.mean(jnp.square(z - mu), axis=-1, keepdims=True)
    return (z - mu) * jax.lax.rsqrt(var + eps) * params["ln_g"] + params["ln_b"]


# ---------------------------------------------------------------------------

def _init_params(key, d_in, d_hid, K0, K1):
    k1, k2, k3, k4 = jax.random.split(key, 4)
    return {
        "w1": jax.random.normal(k1, (K0, d_in, d_hid), jnp.float32)
              * (1.0 / (d_in * K0)) ** 0.5,
        "b1": jax.random.uniform(k2, (d_hid,), jnp.float32, -0.05, 0.05),
        "w2": jax.random.normal(k3, (K1, d_hid, d_in), jnp.float32)
              * (1.0 / (d_hid * K1)) ** 0.5,
        "b2": jax.random.uniform(k4, (d_in,), jnp.float32, -0.05, 0.05),
        "ln_g": jnp.ones((d_in,), jnp.float32),
        "ln_b": jnp.zeros((d_in,), jnp.float32),
    }


def _run_case(key, *, B, L, d_in, d_hid, kernel, padding, row_tile=None):
    kx, kp = jax.random.split(key)
    x = jax.random.normal(kx, (B, L, d_in), jnp.float32)
    params = _init_params(kp, d_in, d_hid, kernel[0], kernel[1])
    prepared = prepare_ffn_params(params)     # one-time bf16 / im2col weight prep

    out = positionwise_feed_forward(x, prepared, padding=padding,
                                    row_tile=row_tile)
    out = jax.block_until_ready(out)

    ref = positionwise_feed_forward_reference(x, params, kernel=kernel,
                                              padding=padding)
    assert out.shape == (B, L, d_in)
    err = float(jnp.max(jnp.abs(out - ref)))
    # bf16 MXU operands vs. f32 reference -> loose inference-grade tolerance.
    assert jnp.allclose(out, ref, atol=3e-2, rtol=3e-2), f"max abs err {err}"


if __name__ == "__main__":
    key = jax.random.PRNGKey(0)
    ks = jax.random.split(key, 4)

    # 1) lane-aligned d_in -> im2col conv1, pointwise conv2; multi-tile with halos.
    _run_case(ks[0], B=2, L=24, d_in=128, d_hid=256, kernel=(3, 1),
              padding=(1, 0), row_tile=8)

    # 2) both convs K=3, ragged L (partial last tile, rem < halo) -> boundary paths.
    _run_case(ks[1], B=2, L=33, d_in=128, d_hid=128, kernel=(3, 3),
              padding=(1, 1), row_tile=16)

    # 3) auto (VMEM-derived) row tile, FastSpeech-style 9-tap conv1, single tile.
    _run_case(ks[2], B=2, L=16, d_in=128, d_hid=256, kernel=(9, 1),
              padding=(4, 0))

    # 4) lane-unaligned channels -> per-tap fallback matmul path.
    _run_case(ks[3], B=2, L=32, d_in=32, d_hid=64, kernel=(3, 3),
              padding=(1, 1), row_tile=8)

    print("KERNEL_OK")
</pallas_src>

<mosaic_0001>
module attributes {stable_mosaic.version = 11 : i64} {
  func.func @_ffn_fused_kernel(%arg0: i32, %arg1: i32, %arg2: memref<2x24x128xf32, #tpu.memory_space<any>>, %arg3: memref<1x8x128xf32, #tpu.memory_space<vmem>>, %arg4: memref<384x256xbf16, #tpu.memory_space<vmem>>, %arg5: memref<1x256xf32, #tpu.memory_space<vmem>>, %arg6: memref<256x128xbf16, #tpu.memory_space<vmem>>, %arg7: memref<1x128xf32, #tpu.memory_space<vmem>>, %arg8: memref<1x128xf32, #tpu.memory_space<vmem>>, %arg9: memref<1x128xf32, #tpu.memory_space<vmem>>, %arg10: memref<1x8x128xf32, #tpu.memory_space<vmem>>, %arg11: memref<10x128xf32, #tpu.memory_space<vmem>>, %arg12: memref<2x!tpu.dma_semaphore, #tpu.memory_space<semaphore_mem>>) attributes {dimension_semantics = [#tpu.dimension_semantics<parallel>, #tpu.dimension_semantics<parallel>], iteration_bounds = array<i64: 2, 3>, scalar_prefetch = 0 : i64, scratch_operands = 2 : i64, tpu.core_type = #tpu.core_type<tc>, window_params = [{}, {transform_indices = @transform_1, window_bounds = array<i64: 1, 8, 128>}, {pipeline_mode = #tpu.pipeline_mode<synchronous>, transform_indices = @transform_2, window_bounds = array<i64: 384, 256>}, {pipeline_mode = #tpu.pipeline_mode<synchronous>, transform_indices = @transform_3, window_bounds = array<i64: 1, 256>}, {pipeline_mode = #tpu.pipeline_mode<synchronous>, transform_indices = @transform_4, window_bounds = array<i64: 256, 128>}, {pipeline_mode = #tpu.pipeline_mode<synchronous>, transform_indices = @transform_5, window_bounds = array<i64: 1, 128>}, {pipeline_mode = #tpu.pipeline_mode<synchronous>, transform_indices = @transform_6, window_bounds = array<i64: 1, 128>}, {pipeline_mode = #tpu.pipeline_mode<synchronous>, transform_indices = @transform_7, window_bounds = array<i64: 1, 128>}, {transform_indices = @transform_8, window_bounds = array<i64: 1, 8, 128>}]} {
    %c8_i32 = arith.constant 8 : i32
    %0 = arith.muli %arg1, %c8_i32 : i32
    %c0_i32 = arith.constant 0 : i32
    %1 = arith.cmpi sgt, %arg1, %c0_i32 : i32
    %2 = arith.extui %1 : i1 to i32
    %c0_i32_0 = arith.constant 0 : i32
    %3 = arith.cmpi ne, %2, %c0_i32_0 : i32
    scf.if %3 {
      %c1_i32 = arith.constant 1 : i32
      %69 = arith.subi %0, %c1_i32 : i32
      %c0_i32_37 = arith.constant 0 : i32
      %c0_i32_38 = arith.constant 0 : i32
      %70 = tpu.memref_slice %arg2[%arg0, %69, %c0_i32_38] : memref<2x24x128xf32, #tpu.memory_space<any>> -> memref<1x1x128xf32, #tpu.memory_space<any>>
      %71 = tpu.memref_squeeze %70 : memref<1x1x128xf32, #tpu.memory_space<any>> -> memref<1x128xf32, #tpu.memory_space<any>>
      %c0_i32_39 = arith.constant 0 : i32
      %c0_i32_40 = arith.constant 0 : i32
      %72 = tpu.memref_slice %arg11[%c0_i32_39, %c0_i32_40] : memref<10x128xf32, #tpu.memory_space<vmem>> -> memref<1x128xf32, #tpu.memory_space<vmem>>
      %73 = tpu.memref_slice %arg12[%c0_i32_37] : memref<2x!tpu.dma_semaphore, #tpu.memory_space<semaphore_mem>> -> memref<1x!tpu.dma_semaphore, #tpu.memory_space<semaphore_mem>>
      %74 = tpu.memref_squeeze %73 : memref<1x!tpu.dma_semaphore, #tpu.memory_space<semaphore_mem>> -> memref<!tpu.dma_semaphore, #tpu.memory_space<semaphore_mem>>
      tpu.enqueue_dma source(%71 : memref<1x128xf32, #tpu.memory_space<any>>) target(%72 : memref<1x128xf32, #tpu.memory_space<vmem>>) target_semaphore(%74 : memref<!tpu.dma_semaphore, #tpu.memory_space<semaphore_mem>>)
    } else {
    }
    %c0_i32_1 = arith.constant 0 : i32
    %4 = arith.cmpi eq, %arg1, %c0_i32_1 : i32
    %5 = arith.extui %4 : i1 to i32
    %c0_i32_2 = arith.constant 0 : i32
    %6 = arith.cmpi ne, %5, %c0_i32_2 : i32
    scf.if %6 {
      %cst_37 = arith.constant 0.000000e+00 : f32
      %69 = vector.broadcast %cst_37 : f32 to vector<1x128xf32>
      %c0_38 = arith.constant 0 : index
      %c0_39 = arith.constant 0 : index
      %70 = vector.load %arg11[%c0_38, %c0_39] : memref<10x128xf32, #tpu.memory_space<vmem>>, vector<1x128xf32>
      tpu.vector_store %arg11[%c0_38, %c0_39], %69 {strides = array<i32>} : memref<10x128xf32, #tpu.memory_space<vmem>>, vector<1x128xf32>,
    } else {
    }
    %c2_i32 = arith.constant 2 : i32
    %7 = arith.cmpi slt, %arg1, %c2_i32 : i32
    %8 = arith.extui %7 : i1 to i32
    %c0_i32_3 = arith.constant 0 : i32
    %9 = arith.cmpi ne, %8, %c0_i32_3 : i32
    scf.if %9 {
      %c8_i32_37 = arith.constant 8 : i32
      %69 = arith.addi %0, %c8_i32_37 : i32
      %c1_i32 = arith.constant 1 : i32
      %c0_i32_38 = arith.constant 0 : i32
      %70 = tpu.memref_slice %arg2[%arg0, %69, %c0_i32_38] : memref<2x24x128xf32, #tpu.memory_space<any>> -> memref<1x1x128xf32, #tpu.memory_space<any>>
      %71 = tpu.memref_squeeze %70 : memref<1x1x128xf32, #tpu.memory_space<any>> -> memref<1x128xf32, #tpu.memory_space<any>>
      %c9_i32 = arith.constant 9 : i32
      %c0_i32_39 = arith.constant 0 : i32
      %72 = tpu.memref_slice %arg11[%c9_i32, %c0_i32_39] : memref<10x128xf32, #tpu.memory_space<vmem>> -> memref<1x128xf32, #tpu.memory_space<vmem>>
      %73 = tpu.memref_slice %arg12[%c1_i32] : memref<2x!tpu.dma_semaphore, #tpu.memory_space<semaphore_mem>> -> memref<1x!tpu.dma_semaphore, #tpu.memory_space<semaphore_mem>>
      %74 = tpu.memref_squeeze %73 : memref<1x!tpu.dma_semaphore, #tpu.memory_space<semaphore_mem>> -> memref<!tpu.dma_semaphore, #tpu.memory_space<semaphore_mem>>
      tpu.enqueue_dma source(%71 : memref<1x128xf32, #tpu.memory_space<any>>) target(%72 : memref<1x128xf32, #tpu.memory_space<vmem>>) target_semaphore(%74 : memref<!tpu.dma_semaphore, #tpu.memory_space<semaphore_mem>>)
    } else {
    }
    %c2_i32_4 = arith.constant 2 : i32
    %10 = arith.cmpi eq, %arg1, %c2_i32_4 : i32
    %11 = arith.extui %10 : i1 to i32
    %c0_i32_5 = arith.constant 0 : i32
    %12 = arith.cmpi ne, %11, %c0_i32_5 : i32
    scf.if %12 {
      %cst_37 = arith.constant 0.000000e+00 : f32
      %69 = vector.broadcast %cst_37 : f32 to vector<1x128xf32>
      %c9 = arith.constant 9 : index
      %c0_38 = arith.constant 0 : index
      %70 = vector.load %arg11[%c9, %c0_38] : memref<10x128xf32, #tpu.memory_space<vmem>>, vector<1x128xf32>
      tpu.vector_store %arg11[%c9, %c0_38], %69 {strides = array<i32>} : memref<10x128xf32, #tpu.memory_space<vmem>>, vector<1x128xf32>,
    } else {
    }
    %c0 = arith.constant 0 : index
    %c0_6 = arith.constant 0 : index
    %c0_7 = arith.constant 0 : index
    %13 = vector.load %arg3[%c0, %c0_6, %c0_7] : memref<1x8x128xf32, #tpu.memory_space<vmem>>, vector<1x8x128xf32>
    %14 = vector.shape_cast %13 : vector<1x8x128xf32> to vector<8x128xf32>
    %c1 = arith.constant 1 : index
    %c0_8 = arith.constant 0 : index
    %15 = vector.load %arg11[%c1, %c0_8] : memref<10x128xf32, #tpu.memory_space<vmem>>, vector<8x128xf32>
    tpu.vector_store %arg11[%c1, %c0_8], %14 {strides = array<i32>} : memref<10x128xf32, #tpu.memory_space<vmem>>, vector<8x128xf32>,
    %c0_i32_9 = arith.constant 0 : i32
    %16 = arith.cmpi sgt, %arg1, %c0_i32_9 : i32
    %17 = arith.extui %16 : i1 to i32
    %c0_i32_10 = arith.constant 0 : i32
    %18 = arith.cmpi ne, %17, %c0_i32_10 : i32
    scf.if %18 {
      %c1_i32 = arith.constant 1 : i32
      %69 = arith.subi %0, %c1_i32 : i32
      %c0_i32_37 = arith.constant 0 : i32
      %c0_i32_38 = arith.constant 0 : i32
      %70 = tpu.memref_slice %arg2[%arg0, %69, %c0_i32_38] : memref<2x24x128xf32, #tpu.memory_space<any>> -> memref<1x1x128xf32, #tpu.memory_space<any>>
      %71 = tpu.memref_squeeze %70 : memref<1x1x128xf32, #tpu.memory_space<any>> -> memref<1x128xf32, #tpu.memory_space<any>>
      %c0_i32_39 = arith.constant 0 : i32
      %c0_i32_40 = arith.constant 0 : i32
      %72 = tpu.memref_slice %arg11[%c0_i32_39, %c0_i32_40] : memref<10x128xf32, #tpu.memory_space<vmem>> -> memref<1x128xf32, #tpu.memory_space<vmem>>
      %73 = tpu.memref_slice %arg12[%c0_i32_37] : memref<2x!tpu.dma_semaphore, #tpu.memory_space<semaphore_mem>> -> memref<1x!tpu.dma_semaphore, #tpu.memory_space<semaphore_mem>>
      %74 = tpu.memref_squeeze %73 : memref<1x!tpu.dma_semaphore, #tpu.memory_space<semaphore_mem>> -> memref<!tpu.dma_semaphore, #tpu.memory_space<semaphore_mem>>
      tpu.wait_dma2 semaphore(%74 : memref<!tpu.dma_semaphore, #tpu.memory_space<semaphore_mem>>) src(%71 : memref<1x128xf32, #tpu.memory_space<any>>) dst(%72 : memref<1x128xf32, #tpu.memory_space<vmem>>)
    } else {
    }
    %c2_i32_11 = arith.constant 2 : i32
    %19 = arith.cmpi slt, %arg1, %c2_i32_11 : i32
    %20 = arith.extui %19 : i1 to i32
    %c0_i32_12 = arith.constant 0 : i32
    %21 = arith.cmpi ne, %20, %c0_i32_12 : i32
    scf.if %21 {
      %c8_i32_37 = arith.constant 8 : i32
      %69 = arith.addi %0, %c8_i32_37 : i32
      %c1_i32 = arith.constant 1 : i32
      %c0_i32_38 = arith.constant 0 : i32
      %70 = tpu.memref_slice %arg2[%arg0, %69, %c0_i32_38] : memref<2x24x128xf32, #tpu.memory_space<any>> -> memref<1x1x128xf32, #tpu.memory_space<any>>
      %71 = tpu.memref_squeeze %70 : memref<1x1x128xf32, #tpu.memory_space<any>> -> memref<1x128xf32, #tpu.memory_space<any>>
      %c9_i32 = arith.constant 9 : i32
      %c0_i32_39 = arith.constant 0 : i32
      %72 = tpu.memref_slice %arg11[%c9_i32, %c0_i32_39] : memref<10x128xf32, #tpu.memory_space<vmem>> -> memref<1x128xf32, #tpu.memory_space<vmem>>
      %73 = tpu.memref_slice %arg12[%c1_i32] : memref<2x!tpu.dma_semaphore, #tpu.memory_space<semaphore_mem>> -> memref<1x!tpu.dma_semaphore, #tpu.memory_space<semaphore_mem>>
      %74 = tpu.memref_squeeze %73 : memref<1x!tpu.dma_semaphore, #tpu.memory_space<semaphore_mem>> -> memref<!tpu.dma_semaphore, #tpu.memory_space<semaphore_mem>>
      tpu.wait_dma2 semaphore(%74 : memref<!tpu.dma_semaphore, #tpu.memory_space<semaphore_mem>>) src(%71 : memref<1x128xf32, #tpu.memory_space<any>>) dst(%72 : memref<1x128xf32, #tpu.memory_space<vmem>>)
    } else {
    }
    %c0_13 = arith.constant 0 : index
    %c0_14 = arith.constant 0 : index
    %22 = vector.load %arg11[%c0_13, %c0_14] : memref<10x128xf32, #tpu.memory_space<vmem>>, vector<10x128xf32>
    %23 = arith.truncf %22 : vector<10x128xf32> to vector<10x128xbf16>
    %24 = vector.extract_strided_slice %23 {offsets = [0, 0], sizes = [8, 128], strides = [1, 1]} : vector<10x128xbf16> to vector<8x128xbf16>
    %25 = vector.extract_strided_slice %23 {offsets = [1, 0], sizes = [8, 128], strides = [1, 1]} : vector<10x128xbf16> to vector<8x128xbf16>
    %26 = vector.extract_strided_slice %23 {offsets = [2, 0], sizes = [8, 128], strides = [1, 1]} : vector<10x128xbf16> to vector<8x128xbf16>
    %27 = tpu.concatenate %24, %25, %26 in 1 : vector<8x128xbf16>, vector<8x128xbf16>, vector<8x128xbf16> -> vector<8x384xbf16>
    %c0_15 = arith.constant 0 : index
    %c0_16 = arith.constant 0 : index
    %28 = vector.load %arg4[%c0_15, %c0_16] : memref<384x256xbf16, #tpu.memory_space<vmem>>, vector<384x256xbf16>
    %cst = arith.constant dense<0.000000e+00> : vector<8x256xf32>
    %29 = tpu.matmul %27, %28, %cst {dimension_numbers = #tpu.dot_dimension_numbers<[1], [0], [0], [1], [0, 0, 1, 1], [], []>} : vector<8x384xbf16>, vector<384x256xbf16>, vector<8x256xf32> -> vector<8x256xf32>
    %c0_17 = arith.constant 0 : index
    %c0_18 = arith.constant 0 : index
    %30 = vector.load %arg5[%c0_17, %c0_18] : memref<1x256xf32, #tpu.memory_space<vmem>>, vector<1x256xf32>
    %31 = vector.broadcast %30 : vector<1x256xf32> to vector<8x256xf32>
    %32 = arith.addf %29, %31 : vector<8x256xf32>
    %cst_19 = arith.constant 0.000000e+00 : f32
    %33 = vector.broadcast %cst_19 : f32 to vector<8x256xf32>
    %34 = arith.maximumf %32, %33 : vector<8x256xf32>
    %35 = arith.truncf %34 : vector<8x256xf32> to vector<8x256xbf16>
    %c0_20 = arith.constant 0 : index
    %c0_21 = arith.constant 0 : index
    %36 = vector.load %arg6[%c0_20, %c0_21] : memref<256x128xbf16, #tpu.memory_space<vmem>>, vector<256x128xbf16>
    %cst_22 = arith.constant dense<0.000000e+00> : vector<8x128xf32>
    %37 = tpu.matmul %35, %36, %cst_22 {dimension_numbers = #tpu.dot_dimension_numbers<[1], [0], [0], [1], [0, 0, 1, 1], [], []>} : vector<8x256xbf16>, vector<256x128xbf16>, vector<8x128xf32> -> vector<8x128xf32>
    %c0_23 = arith.constant 0 : index
    %c0_24 = arith.constant 0 : index
    %38 = vector.load %arg7[%c0_23, %c0_24] : memref<1x128xf32, #tpu.memory_space<vmem>>, vector<1x128xf32>
    %39 = vector.broadcast %38 : vector<1x128xf32> to vector<8x128xf32>
    %40 = arith.addf %37, %39 : vector<8x128xf32>
    %41 = arith.addf %40, %14 : vector<8x128xf32>
    %cst_25 = arith.constant dense<0.000000e+00> : vector<8xf32>
    %42 = vector.multi_reduction <add>, %41, %cst_25 [1] : vector<8x128xf32> to vector<8xf32>
    %43 = vector.shape_cast %42 : vector<8xf32> to vector<8x1xf32>
    %cst_26 = arith.constant 1.280000e+02 : f32
    %44 = vector.broadcast %cst_26 : f32 to vector<8x1xf32>
    %45 = arith.divf %43, %44 : vector<8x1xf32>
    %46 = vector.broadcast %45 : vector<8x1xf32> to vector<8x128xf32>
    %47 = arith.subf %41, %46 : vector<8x128xf32>
    %48 = arith.mulf %47, %47 : vector<8x128xf32>
    %cst_27 = arith.constant dense<0.000000e+00> : vector<8xf32>
    %49 = vector.multi_reduction <add>, %48, %cst_27 [1] : vector<8x128xf32> to vector<8xf32>
    %50 = vector.shape_cast %49 : vector<8xf32> to vector<8x1xf32>
    %cst_28 = arith.constant 1.280000e+02 : f32
    %51 = vector.broadcast %cst_28 : f32 to vector<8x1xf32>
    %52 = arith.divf %50, %51 : vector<8x1xf32>
    %53 = vector.broadcast %45 : vector<8x1xf32> to vector<8x128xf32>
    %54 = arith.subf %41, %53 : vector<8x128xf32>
    %cst_29 = arith.constant 9.99999974E-6 : f32
    %55 = vector.broadcast %cst_29 : f32 to vector<8x1xf32>
    %56 = arith.addf %52, %55 : vector<8x1xf32>
    %57 = math.rsqrt %56 : vector<8x1xf32>
    %58 = vector.broadcast %57 : vector<8x1xf32> to vector<8x128xf32>
    %59 = arith.mulf %54, %58 : vector<8x128xf32>
    %c0_30 = arith.constant 0 : index
    %c0_31 = arith.constant 0 : index
    %60 = vector.load %arg8[%c0_30, %c0_31] : memref<1x128xf32, #tpu.memory_space<vmem>>, vector<1x128xf32>
    %61 = vector.broadcast %60 : vector<1x128xf32> to vector<8x128xf32>
    %62 = arith.mulf %59, %61 : vector<8x128xf32>
    %c0_32 = arith.constant 0 : index
    %c0_33 = arith.constant 0 : index
    %63 = vector.load %arg9[%c0_32, %c0_33] : memref<1x128xf32, #tpu.memory_space<vmem>>, vector<1x128xf32>
    %64 = vector.broadcast %63 : vector<1x128xf32> to vector<8x128xf32>
    %65 = arith.addf %62, %64 : vector<8x128xf32>
    %c0_34 = arith.constant 0 : index
    %c0_35 = arith.constant 0 : index
    %c0_36 = arith.constant 0 : index
    %66 = vector.load %arg10[%c0_34, %c0_35, %c0_36] : memref<1x8x128xf32, #tpu.memory_space<vmem>>, vector<1x8x128xf32>
    %67 = vector.shape_cast %66 : vector<1x8x128xf32> to vector<8x128xf32>
    %68 = vector.shape_cast %65 : vector<8x128xf32> to vector<1x8x128xf32>
    tpu.vector_store %arg10[%c0_34, %c0_35, %c0_36], %68 {strides = array<i32>} : memref<1x8x128xf32, #tpu.memory_space<vmem>>, vector<1x8x128xf32>,
    return
  }
  func.func @transform_1(%arg0: i32, %arg1: i32) -> (i32, i32, i32) {
    %c0_i32 = arith.constant 0 : i32
    %c0_i32_0 = arith.constant 0 : i32
    return %arg0, %arg1, %c0_i32 : i32, i32, i32
  }
  func.func @transform_2(%arg0: i32, %arg1: i32) -> (i32, i32) {
    %c0_i32 = arith.constant 0 : i32
    %c0_i32_0 = arith.constant 0 : i32
    %c0_i32_1 = arith.constant 0 : i32
    return %c0_i32, %c0_i32_0 : i32, i32
  }
  func.func @transform_3(%arg0: i32, %arg1: i32) -> (i32, i32) {
    %c0_i32 = arith.constant 0 : i32
    %c0_i32_0 = arith.constant 0 : i32
    %c0_i32_1 = arith.constant 0 : i32
    return %c0_i32, %c0_i32_0 : i32, i32
  }
  func.func @transform_4(%arg0: i32, %arg1: i32) -> (i32, i32) {
    %c0_i32 = arith.constant 0 : i32
    %c0_i32_0 = arith.constant 0 : i32
    %c0_i32_1 = arith.constant 0 : i32
    return %c0_i32, %c0_i32_0 : i32, i32
  }
  func.func @transform_5(%arg0: i32, %arg1: i32) -> (i32, i32) {
    %c0_i32 = arith.constant 0 : i32
    %c0_i32_0 = arith.constant 0 : i32
    %c0_i32_1 = arith.constant 0 : i32
    return %c0_i32, %c0_i32_0 : i32, i32
  }
  func.func @transform_6(%arg0: i32, %arg1: i32) -> (i32, i32) {
    %c0_i32 = arith.constant 0 : i32
    %c0_i32_0 = arith.constant 0 : i32
    %c0_i32_1 = arith.constant 0 : i32
    return %c0_i32, %c0_i32_0 : i32, i32
  }
  func.func @transform_7(%arg0: i32, %arg1: i32) -> (i32, i32) {
    %c0_i32 = arith.constant 0 : i32
    %c0_i32_0 = arith.constant 0 : i32
    %c0_i32_1 = arith.constant 0 : i32
    return %c0_i32, %c0_i32_0 : i32, i32
  }
  func.func @transform_8(%arg0: i32, %arg1: i32) -> (i32, i32, i32) {
    %c0_i32 = arith.constant 0 : i32
    %c0_i32_0 = arith.constant 0 : i32
    return %arg0, %arg1, %c0_i32 : i32, i32, i32
  }
}

</mosaic_0001>

<bundles_post_ra>
// kernel: tpu_custom_call.1
= control target key start
LH: loop header
LB: loop body
LE: loop exit
PB: predicated region body
PF: predicated region fallthrough
CT: control target
= control target key end

     0   :  { %s2175_s0 = inlined_call_operand.hbm [shape: f32[2,24,128], index: 0, kind: input, shape index: {}]   ;;  %s2176_s1 = inlined_call_operand.hbm [shape: f32[2,24,128], index: 1, kind: input, shape index: {}]   ;;  %s2177_s2 = inlined_call_operand.hbm [shape: bf16[384,256], index: 2, kind: input, shape index: {}]   ;;  %s2178_s3 = inlined_call_operand.vmem [shape: f32[1,256], index: 3, kind: input, shape index: {}]   ;;  %s2179_s4 = inlined_call_operand.hbm [shape: bf16[256,128], index: 4, kind: input, shape index: {}]   ;;  %s2180_s5 = inlined_call_operand.vmem [shape: f32[1,128], index: 5, kind: input, shape index: {}]   ;;  %s2181_s6 = inlined_call_operand.vmem [shape: f32[1,128], index: 6, kind: input, shape index: {}]   ;;  %s2182_s7 = inlined_call_operand.vmem [shape: f32[1,128], index: 7, kind: input, shape index: {}]   ;;  %s2183_s8 = inlined_call_operand.hbm [shape: f32[2,24,128], index: 8, kind: output, shape index: {}]  }
   0x1   :  { %2198 = sst [smem:[#allocation26_spill]] %s2177_s2 }
   0x2   :  { %2199 = sst [smem:[#allocation27_spill]] %s2179_s4 }
   0x3   :  { %2200 = sst [smem:[#allocation28_spill]] %s2181_s6 }
   0x4   :  { %2201 = sst [smem:[#allocation29_spill]] %s2182_s7 }
   0x5   :  { %2202 = sst [smem:[#allocation30_spill]] %s2183_s8 }
   0x6   :  { %13 = vsyncpa [#allocation5], 0 }
   0x7   :  { %15 = vsyncpa [#allocation5 + $0x1], 0 }
   0x8   :  { %16 = vsyncpa [#allocation8], 0 }
   0x9   :  { %17 = vsyncpa [#allocation6], 0 }
   0xa   :  { %19 = vsyncpa [#allocation6 + $0x1], 0  ;;  %s1807_s27 = smov 0   ;;  %s1809_s28 = smov 0  }
   0xb   :  { %s1811_s29 = smov 0   ;;  %s1813_s30 = smov 0  }
   0xc   :  { %s1815_s9 = smov 0   ;;  %s1817_s10 = smov 0  }
   0xd   :  { %s1819_s11 = smov 0   ;;  %s1821_s12 = smov 0  }
   0xe LB: > { %2203 = sst [smem:[#allocation22_spill]] %s1719_s27  ;;  %s1159_s13 = sadd.s32 4294967295, %s1747_s12   ;;  %s1747_s12 = sphi %s1821_s12, %s25_s12   ;;  %s1743_s11 = sphi %s1819_s11, %s2242_s11   ;;  %s1739_s10 = sphi %s1817_s10, %s2241_s10   ;;  %s1735_s9 = sphi %s1815_s9, %s2240_s9   ;;  %s1731_s30 = sphi %s1813_s30, %s2239_s30   ;;  %s1727_s29 = sphi %s1811_s29, %s2238_s29   ;;  %s1723_s28 = sphi %s1809_s28, %s2237_s28   ;;  %s1719_s27 = sphi %s1807_s27, %s2236_s27  }
   0xf   : > { %s1160_s14 = sadd.s32 4294967294, %s1747_s12   ;;  %p59_p0 = scmp.ne.s32.totalorder %s1723_s28, %s1719_s27 }
  0x10   : > { %p1851_p1 = scmp.eq.s32.totalorder %s1159_s13, 0  ;;  %p1855_p2 = scmp.eq.s32.totalorder %s1159_s13, 5 }
  0x11   : > { %p217_p3 = scmp.eq.s32.totalorder %s1160_s14, 5  ;;  %p1161_p5 = scmp.ge.s32.totalorder %s1747_s12, 1 }
  0x12   : > { %s2204_s15 = scalar_select %p1851_p1, 1, 0 }
  0x13   : > { %s2205_s16 = scalar_select %p1855_p2, 1, 0 }
  0x14   : > { %p1861_p4 = por %p1851_p1, %p59_p0  ;;  %p1866_p6 = por %p217_p3, %p59_p0 }
  0x15   : > { %p224_p7 = scmp.lt.s32.totalorder %s1747_s12, 7  ;;  %s1749_s20 = smov [#allocation7]  }
  0x16   : > { %s2206_s17 = scalar_select %p1861_p4, 1, 0 }
  0x17   : > { %s2207_s18 = scalar_select %p1866_p6, 1, 0 }
  0x18   : > { %p1871_p8 = pnand %p1161_p5, %p224_p7  ;;  %s236_s21 = sshll.u32 %s1749_s20, 4  ;;  %s237_s21 = int_to_ptr.vmem [resolvable:$true] %s236_s21 }
  0x19   : > { %2208 = sst [smem:[#allocation23_spill]] %s2207_s18  ;;  %s1750_s23 = smov [#allocation9]  }
  0x1a   : > { %s2209_s19 = scalar_select %p1871_p8, 1, 0 }
  0x1b   : > { %p1304_p9 = pneg %p1871_p8  ;;  %s252_s24 = sshll.u32 %s1750_s23, 4  ;;  %s1883_s24 = int_to_ptr.vmem [resolvable:$true] %s252_s24 }
  0x1c   : > { %s2211_s2 = sld [smem:[#allocation26_spill]] }
  0x1d   : > { %p1879_p10 = pnand %p1304_p9, %p1851_p1 }
  0x1f   : > { %p1496_p12 = pneg %p1879_p10 }
  0x22   : > { %s1494_s13 = scalar_lea.hbm %s2211_s2, 6144 }
  0x23   : > { %p1495_p11 = scmp.ne.s32.totalorder %s2211_s2, %s1494_s13  ;;  %p1501_p3 = scmp.lt.u32.totalorder %s1494_s13, %s2211_s2 }
  0x25   : > { %p1497_p13 = pnand %p1496_p12, %p1495_p11 }
  0x27   : > { %p1498_p0 = pneg %p1497_p13 }
  0x29   : > { %p1503_p5 = pnand %p1501_p3, %p1498_p0 }
  0x2b   : > { %1506 = shalt.err (!%p1503_p5)
}
  0x2c   : > { %s1507_s23 = scalar_lea.vmem %s237_s21, 6144  ;;  %p1515_p1 = scmp.lt.s32.totalorder %s237_s21, %s237_s21 }
  0x2d   : > { %p1508_p7 = scmp.ne.s32.totalorder %s237_s21, %s1507_s23  ;;  %p1516_p4 = scmp.lt.s32.totalorder %s1507_s23, %s1507_s23 }
  0x2f   : > { %p1510_p9 = pnand %p1508_p7, %p1496_p12  ;;  %p1517_p8 = por %p1516_p4, %p1515_p1 }
  0x31   : > { %p1511_p6 = pneg %p1510_p9 }
  0x33   : > { %p1518_p2 = pnand %p1517_p8, %p1511_p6 }
  0x35   : > { %1521 = shalt.err (!%p1518_p2)
}
  0x36   : > { %s1751_s25 = smov 128   ;;  %s1752_s26 = smov 8  }
  0x37   : > { %1307 = dma.hbm_to_vmem [thread:$0]  (!%p1879_p10), %s2211_s2, 6144, %s237_s21, [#allocation8], %s1751_s25, %s1751_s25, %s1752_s26  }
  0x38   : > { %s2212_s4 = sld [smem:[#allocation27_spill]] }
  0x3e   : > { %s1522_s20 = scalar_lea.hbm %s2212_s4, 2048 }
  0x3f   : > { %p1523_p11 = scmp.ne.s32.totalorder %s2212_s4, %s1522_s20  ;;  %p1529_p4 = scmp.lt.u32.totalorder %s1522_s20, %s2212_s4 }
  0x41   : > { %p1525_p1 = pnand %p1523_p11, %p1496_p12 }
  0x43   : > { %p1526_p2 = pneg %p1525_p1 }
  0x45   : > { %p1531_p6 = pnand %p1529_p4, %p1526_p2 }
  0x47   : > { %1534 = shalt.err (!%p1531_p6)
}
  0x48   : > { %s1535_s21 = scalar_lea.vmem %s1883_s24, 2048  ;;  %p1543_p3 = scmp.lt.s32.totalorder %s1883_s24, %s1883_s24 }
  0x49   : > { %p1536_p8 = scmp.ne.s32.totalorder %s1883_s24, %s1535_s21  ;;  %p1544_p5 = scmp.lt.s32.totalorder %s1535_s21, %s1535_s21 }
  0x4b   : > { %p1538_p13 = pnand %p1536_p8, %p1496_p12  ;;  %p1545_p7 = por %p1544_p5, %p1543_p3 }
  0x4d   : > { %p1539_p0 = pneg %p1538_p13 }
  0x4f   : > { %p1546_p9 = pnand %p1545_p7, %p1539_p0 }
  0x51   : > { %1549 = shalt.err (!%p1546_p9)
}
  0x52   : > { %s1753_s6 = smov 64   ;;  %s1754_s7 = smov 4  }
  0x53   : > { %1310 = dma.hbm_to_vmem [thread:$0]  (!%p1879_p10), %s2212_s4, 2048, %s1883_s24, [#allocation8], %s1753_s6, %s1753_s6, %s1754_s7  }
  0x54   : > { %s34_s26 = sadd.s32 1, %s1739_s10  ;;  %s37_s27 = sadd.s32 1, %s1743_s11 }
  0x55   : > { %p35_p12 = scmp.ge.s32.totalorder %s34_s26, 3  ;;  %s46_s18 = sadd.s32 1, %s1727_s29 }
  0x56   : > { %p53_p11 = scmp.ne.s32.totalorder %s1727_s29, %s1723_s28  ;;  %p54_p1 = scmp.eq.s32.totalorder %s1747_s12, 0 }
  0x57   : > { %s2244_s26 = smov (%p35_p12, %s34_s26), 0  ;;  %s2246_s27 = smov (!%p35_p12, %s37_s27), %s1743_s11 }
  0x58   : > { %2213 = sst [smem:[#allocation24_spill]] %s2244_s26  ;;  %s42_s13 = ssub.s32 %s1739_s10, %s2244_s26 }
  0x59   : > { %p1943_p2 = por %p54_p1, %p53_p11  ;;  %p39_p10 = scmp.ge.s32.totalorder %s2246_s27, 2 }
  0x5a   : > { %p2215_p4 = scmp.ne.s32.totalorder %s2205_s16, 0  ;;  %p1321_p8 = scmp.lt.s32.totalorder %s1747_s12, 6 }
  0x5b   : > { %s275_s14 = sand.u32 1, %s1727_s29   ;;  %s2248_s27 = smov (%p39_p10, %s2246_s27), 0 }
  0x5c   : > { %p1949_p6 = por %p2215_p4, %p53_p11  ;;  %s1165_s20 = sshll.u32 %s275_s14, 3 }
  0x5d   : > { %s41_s23 = ssub.s32 %s1743_s11, %s2248_s27  ;;  %s1282_s6 = smul.u32 3, %s1743_s11 }
  0x5e   : > { %s2216_s24 = scalar_select %p1949_p6, 1, 0 }
  0x5f   : > { %s43_s21 = sor.u32 %s42_s13, %s41_s23  ;;  %s279_s7 = scalar_lea.vmem [#allocation4], %s1165_s20 }
  0x60   : > { %2217 = sst [smem:[#allocation25_spill]] %s2216_s24  ;;  %p44_p13 = scmp.eq.s32.totalorder %s43_s21, 0 }
  0x61   : > { %s288_s8 = sshll.u32 %s279_s7, 4  ;;  %s284_s25 = sadd.s32 %s1739_s10, %s1282_s6  ;;  %s1961_s8 = int_to_ptr.vmem [resolvable:$true] %s288_s8 }
  0x62   : > { %s1964_s16 = scalar_select %p44_p13, %s1727_s29, %s46_s18  }
  0x63   : > { %s1166_s2 = sshll.u32 %s284_s25, 7  ;;  %p1970_p0 = pnand %p1321_p8, %p1943_p2 }
  0x64   : > { %s1977_s13 = scalar_lea.hbm %s2176_s1, %s1166_s2  ;;  %s276_s18 = scalar_lea.sflag [#allocation5], %s275_s14 }
  0x65   : > { %s1550_s20 = scalar_lea.hbm %s1977_s13, 128  ;;  %p1552_p5 = pneg %p1970_p0 }
  0x66   : > { %p1551_p3 = scmp.ne.s32.totalorder %s1977_s13, %s1550_s20  ;;  %s1555_s26 = scalar_lea.hbm %s2176_s1, 768 }
  0x67   : > { %p1556_p12 = scmp.lt.u32.totalorder %s1977_s13, %s2176_s1  ;;  %p1557_p11 = scmp.lt.u32.totalorder %s1555_s26, %s1550_s20 }
  0x68   : > { %p1553_p7 = pnand %p1552_p5, %p1551_p3  ;;  %p1559_p2 = scmp.lt.u32.totalorder %s1550_s20, %s1977_s13 }
  0x69   : > { %p1558_p1 = por %p1557_p11, %p1556_p12 }
  0x6a   : > { %p1554_p9 = pneg %p1553_p7 }
  0x6b   : > { %p1560_p10 = por %p1559_p2, %p1558_p1 }
  0x6d   : > { %p1561_p4 = pnand %p1560_p10, %p1554_p9 }
  0x6f   : > { %1564 = shalt.err (!%p1561_p4)
}
  0x70   : > { %s1565_s14 = scalar_lea.vmem %s1961_s8, 128  ;;  %s1755_s21 = smov [#allocation4]  }
  0x71   : > { %p1566_p8 = scmp.ne.s32.totalorder %s1961_s8, %s1565_s14  ;;  %s1570_s6 = sshll.u32 %s1755_s21, 4  ;;  %s1571_s6 = int_to_ptr.vmem [resolvable:$false] %s1570_s6 }
  0x72   : > { %s1572_s7 = scalar_lea.vmem %s1571_s6, 256  ;;  %p1573_p7 = scmp.lt.s32.totalorder %s1961_s8, %s1571_s6 }
  0x73   : > { %p1568_p13 = pnand %p1566_p8, %p1552_p5  ;;  %p1574_p12 = scmp.lt.s32.totalorder %s1572_s7, %s1565_s14 }
  0x75   : > { %p1569_p3 = pneg %p1568_p13  ;;  %p1575_p11 = por %p1574_p12, %p1573_p7 }
  0x77   : > { %p1576_p1 = pnand %p1575_p11, %p1569_p3 }
  0x79   : > { %1579 = shalt.err (!%p1576_p1)
}
  0x7a   : > { %1314 = dma.hbm_to_vmem [thread:$0]  (!%p1970_p0), %s1977_s13, 128, %s1961_s8, %s276_s18  }
  0x7b   : > { %p2219_p9 = scmp.ne.s32.totalorder %s2209_s19, 0 }
  0x7c   : > { %s2007_s25 = sand.u32 (!%p2219_p9), 1, %s1723_s28   ;;  %p2220_p5 = scmp.ne.s32.totalorder (!%p2219_p9), %s2206_s17, 0 }
  0x7d   : > { %297 = sbr.rel (%p2219_p9) target bundleno = 1043 (0x413), region = 48  ;;  %s1168_s20 = sshll.u32 (!%p2219_p9), %s2007_s25, 3 }
  0x7e   : > { %s300_s22 = scalar_lea.sflag (!%p2219_p9), [#allocation5], %s2007_s25  ;;  %s2013_s23 = scalar_lea.vmem (!%p2219_p9), [#allocation4], %s1168_s20 }
  0x84   : > { %1698 = dma.done.wait (%p2220_p5), %s300_s22, 128  }
  0x85   : > { %1700 = vsyncadd (%p2220_p5), %s300_s22, 4294967168  ;;  %p2221_p0 = scmp.ne.s32.totalorder %s2204_s15, 0 }
  0x87   : > { %1702 = dma.done.wait (%p2221_p0), [#allocation8], 8192  }
  0x88   : > { %1704 = vsyncadd (%p2221_p0), [#allocation8], 4294959104  ;;  %s1172_s4 = sshll.u32 %s1731_s30, 3  ;;  %s349_s8 = smul.u32 24, %s1735_s9 }
  0x89   : > { %s1174_s19 = sadd.s32 4294967295, %s1172_s4  ;;  %p2196_p2 = scmp.gt.s32.totalorder %s1731_s30, 0 }
  0x8a   : > { %s350_s17 = sadd.s32 %s1174_s19, %s349_s8  ;;  %s1756_s13 = smov [#allocation2]  }
  0x8b   : > { %s360_s18 = sshll.u32 %s1756_s13, 4  ;;  %s1175_s26 = sshll.u32 %s350_s17, 4  ;;  %s2030_s18 = int_to_ptr.vmem [resolvable:$true] %s360_s18 }
  0x8c   : > { %s352_s2 = scalar_lea.hbm %s2175_s0, %s1175_s26  ;;  %s2195_s7 = scalar_lea.hbm %s2175_s0, 768 }
  0x8d   : > { %s1580_s14 = scalar_lea.hbm %s352_s2, 16  ;;  %p1585_p13 = scmp.lt.u32.totalorder %s352_s2, %s2175_s0 }
  0x8e   : > { %p1581_p10 = scmp.ne.s32.totalorder %s352_s2, %s1580_s14  ;;  %p1586_p3 = scmp.lt.u32.totalorder %s2195_s7, %s1580_s14 }
  0x8f   : > { %p1588_p12 = scmp.lt.u32.totalorder %s1580_s14, %s352_s2 }
  0x90   : > { %p1582_p4 = pnand %p1581_p10, %p2196_p2  ;;  %p1587_p7 = por %p1586_p3, %p1585_p13 }
  0x92   : > { %p1583_p8 = pneg %p1582_p4  ;;  %p1589_p11 = por %p1588_p12, %p1587_p7 }
  0x94   : > { %p1590_p1 = pnand %p1589_p11, %p1583_p8 }
  0x96   : > { %1593 = shalt.err (!%p1590_p1)  }
  0x97   : > { %s1594_s26 = scalar_lea.vmem %s2030_s18, 16  ;;  %s2194_s15 = scalar_lea.vmem %s2030_s18, 256 }
  0x98   : > { %p1595_p9 = scmp.ne.s32.totalorder %s2030_s18, %s1594_s26  ;;  %p1601_p10 = scmp.lt.s32.totalorder %s2030_s18, %s2030_s18 }
  0x99   : > { %p1602_p4 = scmp.lt.s32.totalorder %s2194_s15, %s1594_s26 }
  0x9a   : > { %p1596_p5 = pnand %p1595_p9, %p2196_p2 }
  0x9b   : > { %p1603_p13 = por %p1602_p4, %p1601_p10 }
  0x9c   : > { %p1597_p0 = pneg %p1596_p5 }
  0x9e   : > { %p1604_p3 = pnand %p1603_p13, %p1597_p0 }
  0xa0   : > { %1607 = shalt.err (!%p1604_p3)  }
  0xa1   : > { %1295 = dma.hbm_to_vmem [thread:$0]  (%p2196_p2), %s352_s2, 16, %s2030_s18, [#allocation3] }
  0xa2   : > { %s2061_s24 = scalar_lea.vmem [#allocation10], %s1168_s20  ;;  %p1176_p8 = scmp.ne.s32.totalorder %s1731_s30, 0 }
  0xa3   : > { %v1757_v0 = vmov (!%p1176_p8), 0.0  }
  0xa4   : > { %367 = sbr.rel (%p1176_p8) target bundleno = 171 (0xab), region = 72  ;;  %368 = vst [vmem:[#allocation2] sm:$0x1] (!%p1176_p8), %v1757_v0 }
  0xab PF: > { %p1325_p7 = scmp.lt.s32.totalorder %s1731_s30, 2  ;;  %s1092_s14 = sadd.s32 %s1172_s4, %s349_s8 }
  0xac   : > { %s1179_s21 = sshll.u32 %s1092_s14, 4  ;;  %s1758_s6 = smov [#allocation2 + $0x9]  }
  0xad   : > { %s387_s2 = sshll.u32 %s1758_s6, 4  ;;  %s1094_s19 = scalar_lea.hbm %s2175_s0, %s1179_s21  ;;  %s388_s2 = int_to_ptr.vmem [resolvable:$true] %s387_s2 }
  0xae   : > { %s1095_s17 = scalar_lea.hbm %s1094_s19, 128  ;;  %s1636_s13 = scalar_lea.hbm %s1094_s19, 144 }
  0xaf   : > { %p1609_p12 = scmp.ne.s32.totalorder %s1095_s17, %s1636_s13  ;;  %p1613_p9 = scmp.lt.u32.totalorder %s1095_s17, %s2175_s0 }
  0xb0   : > { %s2222_s8 = scalar_lea.hbm %s2175_s0, 768  ;;  %p1616_p10 = scmp.lt.u32.totalorder %s1636_s13, %s1095_s17 }
  0xb1   : > { %p1610_p11 = pnand %p1609_p12, %p1325_p7  ;;  %p1614_p5 = scmp.lt.u32.totalorder %s2222_s8, %s1636_s13 }
  0xb3   : > { %p1611_p1 = pneg %p1610_p11  ;;  %p1615_p0 = por %p1614_p5, %p1613_p9 }
  0xb5   : > { %p1617_p4 = por %p1616_p10, %p1615_p0 }
  0xb7   : > { %p1618_p13 = pnand %p1617_p4, %p1611_p1 }
  0xb9   : > { %1621 = shalt.err (!%p1618_p13)  }
  0xba   : > { %s1622_s14 = scalar_lea.vmem %s388_s2, 16  ;;  %p1629_p11 = scmp.lt.s32.totalorder %s388_s2, %s2030_s18 }
  0xbb   : > { %p1623_p3 = scmp.ne.s32.totalorder %s388_s2, %s1622_s14  ;;  %s2223_s15 = scalar_lea.vmem %s2030_s18, 256 }
  0xbc   : > { %p1630_p2 = scmp.lt.s32.totalorder %s2223_s15, %s1622_s14 }
  0xbd   : > { %p1624_p8 = pnand %p1623_p3, %p1325_p7 }
  0xbe   : > { %p1631_p6 = por %p1630_p2, %p1629_p11 }
  0xbf   : > { %p1625_p12 = pneg %p1624_p8 }
  0xc1   : > { %p1632_p5 = pnand %p1631_p6, %p1625_p12 }
  0xc3   : > { %1635 = shalt.err (!%p1632_p5)  }
  0xc4   : > { %1297 = dma.hbm_to_vmem [thread:$0]  (%p1325_p7), %s1095_s17, 16, %s388_s2, [#allocation3 + $0x1] }
  0xc5   : > { %p1180_p1 = scmp.ne.s32.totalorder %s1731_s30, 2 }
  0xc6   : > { %v1759_v1 = vmov (!%p1180_p1), 0.0  }
  0xc7   : > { %394 = sbr.rel (%p1180_p1) target bundleno = 206 (0xce), region = 84  ;;  %395 = vst [vmem:[#allocation2 + $0x9] sm:$0x1] (!%p1180_p1), %v1759_v1 }
  0xce PF: > { %v2090_v2 = vld [vmem:[%s2013_s23] sm:$0xff]  ;;  %p2224_p9 = scmp.gt.s32.totalorder %s1731_s30, 0 }
  0xcf   : > { %397 = vst [vmem:[#allocation2 + $0x1] sm:$0xff] %v2090_v2 }
  0xd0   : > { %1706 = dma.done.wait (%p2224_p9), [#allocation3], 16  ;;  %p2225_p6 = pmov %p2224_p9 }
  0xd2   : > { %1708 = vsyncadd (%p2225_p6), [#allocation3], 4294967280 }
  0xd3   : > { %1710 = dma.done.wait (%p1325_p7), [#allocation3 + $0x1], 16 }
  0xd4   : > { %1712 = vsyncadd (%p1325_p7), [#allocation3 + $0x1], 4294967280  ;;  %v1760_v3 = vmov 0   ;;  %v1404_v4 = vld [vmem:[#allocation7 + $0x4] ss:$8 sps:$4 sm:$0xff]   ;;  %v1480_v58 = vld [vmem:[#allocation9 + $0x50] sm:$0xff]  }
  0xd5   : > { %798 = vmatprep.mubr.bf16.mxu1 %v1760_v3  ;;  %v1406_v5 = vld [vmem:[#allocation7] ss:$8 sps:$4 sm:$0xff]   ;;  %725 = vmatprep.subr.bf16.mxu0 %v1404_v4  ;;  %v1407_v6 = vld [vmem:[#allocation7 + $0x14] ss:$8 sps:$4 sm:$0xff]   ;;  %v1409_v7 = vld [vmem:[#allocation7 + $0x10] ss:$8 sps:$4 sm:$0xff]  }
  0xd6   : > { %726 = vmatpush1.bf16.msra.mxu0 %v1406_v5  ;;  %v1410_v8 = vld [vmem:[#allocation7 + $0x24] ss:$8 sps:$4 sm:$0xff]   ;;  %v1412_v9 = vld [vmem:[#allocation7 + $0x20] ss:$8 sps:$4 sm:$0xff]   ;;  %v1413_v10 = vld [vmem:[#allocation7 + $0x34] ss:$8 sps:$4 sm:$0xff]  }
  0xd7   : > { %727 = vmatprep.subr.bf16.mxu0 %v1407_v6  ;;  %v1415_v11 = vld [vmem:[#allocation7 + $0x30] ss:$8 sps:$4 sm:$0xff]   ;;  %v1428_v12 = vld [vmem:[#allocation7 + $0x104] ss:$8 sps:$4 sm:$0xff]   ;;  %v1432_v14 = vld [vmem:[#allocation7 + $0x100] ss:$8 sps:$4 sm:$0xff]  }
  0xd8   : > { %v1416_v13 = vld [vmem:[#allocation7 + $0x44] ss:$8 sps:$4 sm:$0xff]   ;;  %766 = vmatprep.subr.bf16.mxu1 %v1428_v12  ;;  %v1434_v15 = vld [vmem:[#allocation7 + $0x114] ss:$8 sps:$4 sm:$0xff]   ;;  %v1418_v16 = vld [vmem:[#allocation7 + $0x40] ss:$8 sps:$4 sm:$0xff]  }
  0xd9   : > { %767 = vmatpush1.bf16.msra.mxu1 %v1432_v14  ;;  %v1419_v17 = vld [vmem:[#allocation7 + $0x54] ss:$8 sps:$4 sm:$0xff]   ;;  %v1438_v18 = vld [vmem:[#allocation7 + $0x110] ss:$8 sps:$4 sm:$0xff]   ;;  %v1440_v19 = vld [vmem:[#allocation7 + $0x124] ss:$8 sps:$4 sm:$0xff]  }
  0xda   : > { %728 = vmatpush1.bf16.msra.mxu0 %v1409_v7  ;;  %768 = vmatprep.subr.bf16.mxu1 %v1434_v15  ;;  %v1421_v20 = vld [vmem:[#allocation7 + $0x50] ss:$8 sps:$4 sm:$0xff]   ;;  %v1444_v21 = vld [vmem:[#allocation7 + $0x120] ss:$8 sps:$4 sm:$0xff]   ;;  %v1446_v22 = vld [vmem:[#allocation7 + $0x134] ss:$8 sps:$4 sm:$0xff]  }
  0xdb   : > { %729 = vmatprep.subr.bf16.mxu0 %v1410_v8  ;;  %v1422_v23 = vld [vmem:[#allocation7 + $0x64] ss:$8 sps:$4 sm:$0xff]   ;;  %v1450_v24 = vld [vmem:[#allocation7 + $0x130] ss:$8 sps:$4 sm:$0xff]   ;;  %v1424_v25 = vld [vmem:[#allocation7 + $0x60] ss:$8 sps:$4 sm:$0xff]  }
  0xdc   : > { %v1452_v26 = vld [vmem:[#allocation7 + $0x144] ss:$8 sps:$4 sm:$0xff]   ;;  %v1425_v27 = vld [vmem:[#allocation7 + $0x74] ss:$8 sps:$4 sm:$0xff]   ;;  %v1427_v28 = vld [vmem:[#allocation7 + $0x70] ss:$8 sps:$4 sm:$0xff]  }
  0xdd   : > { %769 = vmatpush1.bf16.msra.mxu1 %v1438_v18  ;;  %v1456_v29 = vld [vmem:[#allocation7 + $0x140] ss:$8 sps:$4 sm:$0xff]   ;;  %v1458_v30 = vld [vmem:[#allocation7 + $0x154] ss:$8 sps:$4 sm:$0xff]   ;;  %v1430_v31 = vld [vmem:[#allocation7 + $0x84] ss:$8 sps:$4 sm:$0xff]  }
  0xde   : > { %730 = vmatpush1.bf16.msra.mxu0 %v1412_v9  ;;  %770 = vmatprep.subr.bf16.mxu1 %v1440_v19  ;;  %v1462_v32 = vld [vmem:[#allocation7 + $0x150] ss:$8 sps:$4 sm:$0xff]   ;;  %v1433_v33 = vld [vmem:[#allocation7 + $0x80] ss:$8 sps:$4 sm:$0xff]   ;;  %v1436_v34 = vld [vmem:[#allocation7 + $0x94] ss:$8 sps:$4 sm:$0xff]  }
  0xdf   : > { %731 = vmatprep.subr.bf16.mxu0 %v1413_v10  ;;  %v1464_v35 = vld [vmem:[#allocation7 + $0x164] ss:$8 sps:$4 sm:$0xff]   ;;  %v412_v37 = vld [vmem:[#allocation2 + $0x8] sm:$0x3]  ;;  %v1439_v38 = vld [vmem:[#allocation7 + $0x90] ss:$8 sps:$4 sm:$0xff]  }
  0xe0   : > { %v411_v36 = vld [vmem:[#allocation2] sm:$0xff]  ;;  %v1470_v41 = vld [vmem:[#allocation7 + $0x174] ss:$8 sps:$4 sm:$0xff]   ;;  %v1474_v47 = vld [vmem:[#allocation7 + $0x170] ss:$8 sps:$4 sm:$0xff]   ;;  %s1283_s6 = smul.u32 3, %s1735_s9 }
  0xe1   : > { %771 = vmatpush1.bf16.msra.mxu1 %v1444_v21  ;;  %v413_v39 = vpack.c.bf16 %v412_v37, %v411_v36  ;;  %v1468_v40 = vld [vmem:[#allocation7 + $0x160] ss:$8 sps:$4 sm:$0xff]   ;;  %v1442_v44 = vld [vmem:[#allocation7 + $0xa4] ss:$8 sps:$4 sm:$0xff]   ;;  %v1448_v50 = vld [vmem:[#allocation7 + $0xb4] ss:$8 sps:$4 sm:$0xff]  }
  0xe2   : > { %732 = vmatpush1.bf16.msra.mxu0 %v1415_v11  ;;  %772 = vmatprep.subr.bf16.mxu1 %v1446_v22  ;;  %v1445_v45 = vld [vmem:[#allocation7 + $0xa0] ss:$8 sps:$4 sm:$0xff]   ;;  %v1451_v51 = vld [vmem:[#allocation7 + $0xb0] ss:$8 sps:$4 sm:$0xff]   ;;  %v1454_v54 = vld [vmem:[#allocation7 + $0xc4] ss:$8 sps:$4 sm:$0xff]   ;;  %s1028_s22 = sadd.s32 %s1731_s30, %s1283_s6 }
  0xe3   : > { %733 = vmatprep.subr.bf16.mxu0 %v1416_v13  ;;  %v415_v42 = vshrl.u32 %v413_v39, 16  ;;  %v417_v43 = vshll.u32 %v413_v39, 16  ;;  %v1476_v49 = vld [vmem:[#allocation9 + $0x40] sm:$0xff]   ;;  %v423_v52 = vrot.slane %v413_v39, 1  ;;  %v1478_v55 = vld [vmem:[#allocation9 + $0x48] sm:$0xff]   ;;  %v1481_v60 = vld [vmem:[#allocation9 + $0x10] sm:$0xff]  }
  0xe4   : > { %v1477_v53 = vld [vmem:[#allocation9] sm:$0xff]   ;;  %v1479_v56 = vld [vmem:[#allocation9 + $0x8] sm:$0xff]   ;;  %v1460_v59 = vld [vmem:[#allocation7 + $0xd4] ss:$8 sps:$4 sm:$0xff]   ;;  %s2226_s2 = sld [smem:[#allocation25_spill]]  ;;  %s2227_s17 = sld [smem:[#allocation28_spill]] }
  0xe5   : > { %773 = vmatpush1.bf16.msra.mxu1 %v1450_v24  ;;  %v419_v46 = vrot.slane %v417_v43, 1  ;;  %v1457_v57 = vld [vmem:[#allocation7 + $0xc0] ss:$8 sps:$4 sm:$0xff]   ;;  %v1463_v61 = vld [vmem:[#allocation7 + $0xd0] ss:$8 sps:$4 sm:$0xff]   ;;  %s2228_s4 = sld [smem:[#allocation29_spill]] }
  0xe6   : > { %734 = vmatpush1.bf16.msra.mxu0 %v1418_v16  ;;  %774 = vmatprep.subr.bf16.mxu1 %v1452_v26  ;;  %v1482_v62 = vld [vmem:[#allocation9 + $0x58] sm:$0xff]   ;;  %v1466_v63 = vld [vmem:[#allocation7 + $0xe4] ss:$8 sps:$4 sm:$0xff]   ;;  %v1469_v1 = vld [vmem:[#allocation7 + $0xe0] ss:$8 sps:$4 sm:$0xff]   ;;  %s1251_s8 = sshll.u32 %s1028_s22, 7 }
  0xe7   : > { %735 = vmatprep.subr.bf16.mxu0 %v1419_v17  ;;  %v420_v48 = vor.u32 %v419_v46, %v415_v42  ;;  %v1483_v0 = vld [vmem:[#allocation9 + $0x18] sm:$0xff]   ;;  %v1484_v3 = vld [vmem:[#allocation9 + $0x60] sm:$0xff]   ;;  %v1486_v7 = vld [vmem:[#allocation9 + $0x68] sm:$0xff]   ;;  %v475_v17 = vlaneseq  ;;  %s1032_s14 = sshll.u32 %s2061_s24, 4  ;;  %s2229_s18 = sld [smem:[#allocation30_spill]]  ;;  %s2122_s14 = int_to_ptr.vmem [resolvable:$true] %s1032_s14 }
  0xe8   : > { %v1472_v4 = vld [vmem:[#allocation7 + $0xf4] ss:$8 sps:$4 sm:$0xff]   ;;  %v1485_v5 = vld [vmem:[#allocation9 + $0x20] sm:$0xff]   ;;  %v1475_v6 = vld [vmem:[#allocation7 + $0xf0] ss:$8 sps:$4 sm:$0xff]   ;;  %s1017_s30 = scalar_lea.sflag [#allocation6], %s2007_s25 }
  0xe9   : > { %775 = vmatpush1.bf16.msra.mxu1 %v1456_v29  ;;  %757 = vmatprep.mubr.bf16.mxu0 %v420_v48  ;;  %v1487_v8 = vld [vmem:[#allocation9 + $0x28] sm:$0xff]   ;;  %v1488_v9 = vld [vmem:[#allocation9 + $0x70] sm:$0xff]   ;;  %v1490_v11 = vld [vmem:[#allocation9 + $0x78] sm:$0xff]   ;;  %v476_v18 = vshrl.u32 %v475_v17, 7  ;;  %s1637_s7 = scalar_lea.vmem %s2122_s14, 128  ;;  %s1761_s21 = smov [#allocation10]  }
  0xea   : > { %736 = vmatpush1.bf16.msra.mxu0 %v1421_v20  ;;  %776 = vmatprep.subr.bf16.mxu1 %v1458_v30  ;;  %v1489_v10 = vld [vmem:[#allocation9 + $0x30] sm:$0xff]   ;;  %v1491_v12 = vld [vmem:[#allocation9 + $0x38] sm:$0xff]   ;;  %v473_v20 = vld [vmem:[%s2178_s3] sm:$0x3]  ;;  %p1638_p2 = scmp.ne.s32.totalorder %s2122_s14, %s1637_s7  ;;  %p2230_p7 = scmp.ne.s32.totalorder %s2226_s2, 0 }
  0xeb   : > { %737 = vmatprep.subr.bf16.mxu0 %v1422_v23  ;;  %v477_v19 = vsub.s32 0, %v476_v18  ;;  %v481_v21 = vsub.s32 1, %v476_v18  ;;  %s1641_s6 = sshll.u32 %s1761_s21, 4  ;;  %s1642_s6 = int_to_ptr.vmem [resolvable:$false] %s1641_s6 }
  0xec   : > { %p1639_p0 = pnand %p1638_p2, %p2230_p7  ;;  %s1643_s22 = scalar_lea.vmem %s1642_s6, 256 }
  0xed   : > { %777 = vmatpush1.bf16.msra.mxu1 %v1462_v32  ;;  %v478_v22 = vrot.slane %v473_v20, %v477_v19  ;;  %v482_v23 = vrot.slane %v473_v20, %v481_v21  ;;  %s2120_s9 = scalar_lea.hbm %s2229_s18, %s1251_s8  ;;  %p1644_p4 = scmp.lt.s32.totalorder %s2122_s14, %s1642_s6 }
  0xee   : > { %738 = vmatpush1.bf16.msra.mxu0 %v1424_v25  ;;  %778 = vmatprep.subr.bf16.mxu1 %v1464_v35  ;;  %p1640_p10 = pneg %p1639_p0  ;;  %p1645_p13 = scmp.lt.s32.totalorder %s1643_s22, %s1637_s7 }
  0xef   : > { %739 = vmatprep.subr.bf16.mxu0 %v1425_v27 }
  0xf0   : > { %p1646_p3 = por %p1645_p13, %p1644_p4 }
  0xf1   : > { %779 = vmatpush1.bf16.msra.mxu1 %v1468_v40 }
  0xf2   : > { %740 = vmatpush1.bf16.msra.mxu0 %v1427_v28  ;;  %780 = vmatprep.subr.bf16.mxu1 %v1470_v41  ;;  %p1647_p8 = pnand %p1646_p3, %p1640_p10 }
  0xf3   : > { %741 = vmatprep.subr.bf16.mxu0 %v1430_v31 }
  0xf5   : > { %781 = vmatpush1.bf16.msra.mxu1 %v1474_v47 }
  0xf6   : > { %742 = vmatpush1.bf16.msra.mxu0 %v1433_v33  ;;  %1256 = vmatprep.subr.bf16.mxu1 %v1476_v49 }
  0xf7   : > { %743 = vmatprep.subr.bf16.mxu0 %v1436_v34 }
  0xf8   : > { %799 = vmatmul.mubr.bf16.vlgmr.msra.gmra.mrb[0].mxu1 %v423_v52 }
  0xf9   : > { %1257 = vmatpush3.bf16.msra.mxu1 %v1477_v53  ;;  %v1249_v53 = vld [vmem:[%s2228_s4] ss:$0 sm:$0xff] }
  0xfa   : > { %744 = vmatpush1.bf16.msra.mxu0 %v1439_v38  ;;  %1258 = vmatprep.subr.bf16.mxu1 %v1478_v55  ;;  %v1231_v38 = vld [vmem:[%s2180_s5] ss:$0 sm:$0xff] }
  0xfb   : > { %745 = vmatprep.subr.bf16.mxu0 %v1442_v44 }
  0xfd   : > { %1259 = vmatpush3.bf16.msra.mxu1 %v1479_v56 }
  0xfe   : > { %746 = vmatpush1.bf16.msra.mxu0 %v1445_v45  ;;  %1260 = vmatprep.subr.bf16.mxu1 %v1480_v58 }
  0xff   : > { %747 = vmatprep.subr.bf16.mxu0 %v1448_v50 }
 0x101   : > { %1261 = vmatpush3.bf16.msra.mxu1 %v1481_v60 }
 0x102   : > { %748 = vmatpush1.bf16.msra.mxu0 %v1451_v51  ;;  %1262 = vmatprep.subr.bf16.mxu1 %v1482_v62 }
 0x103   : > { %749 = vmatprep.subr.bf16.mxu0 %v1454_v54 }
 0x105   : > { %1263 = vmatpush3.bf16.msra.mxu1 %v1483_v0 }
 0x106   : > { %750 = vmatpush1.bf16.msra.mxu0 %v1457_v57  ;;  %1264 = vmatprep.subr.bf16.mxu1 %v1484_v3 }
 0x107   : > { %751 = vmatprep.subr.bf16.mxu0 %v1460_v59 }
 0x109   : > { %1265 = vmatpush3.bf16.msra.mxu1 %v1485_v5 }
 0x10a   : > { %752 = vmatpush1.bf16.msra.mxu0 %v1463_v61  ;;  %1266 = vmatprep.subr.bf16.mxu1 %v1486_v7 }
 0x10b   : > { %753 = vmatprep.subr.bf16.mxu0 %v1466_v63 }
 0x10d   : > { %1267 = vmatpush3.bf16.msra.mxu1 %v1487_v8 }
 0x10e   : > { %754 = vmatpush1.bf16.msra.mxu0 %v1469_v1  ;;  %1268 = vmatprep.subr.bf16.mxu1 %v1488_v9 }
 0x10f   : > { %755 = vmatprep.subr.bf16.mxu0 %v1472_v4 }
 0x111   : > { %1269 = vmatpush3.bf16.msra.mxu1 %v1489_v10 }
 0x112   : > { %756 = vmatpush1.bf16.msra.mxu0 %v1475_v6  ;;  %1270 = vmatprep.subr.bf16.mxu1 %v1490_v11 }
 0x115   : > { %758 = vmatmul.mubr.bf16.vlgmr.msra.gmra.mrb[0].mxu0 %v413_v39  ;;  %1271 = vmatpush3.bf16.msra.mxu1 %v1491_v12 }
 0x1cb   : > { %v800_v13 = vpop.f32.mrb[0].mxu1 }
 0x1cc   : > { %v802_v14 = vpop.f32.mrb[1].mxu1 }
 0x1cd   : > { %v804_v15 = vpop.f32.mrb[2].mxu1 }
 0x1ce   : > { %v805_v16 = vpop.f32.mrb[3].mxu1 }
 0x1e8   : > { %v759_v24 = vpop.f32.mrb[0].mxu0 }
 0x1e9   : > { %v760_v25 = vadd.f32 %v759_v24, %v478_v22  ;;  %v761_v26 = vpop.f32.mrb[1].mxu0 }
 0x1ea   : > { %v762_v27 = vadd.f32 %v761_v26, %v482_v23  ;;  %v763_v28 = vpop.f32.mrb[2].mxu0 }
 0x1eb   : > { %v801_v29 = vadd.f32 %v800_v13, %v760_v25  ;;  %v764_v30 = vpop.f32.mrb[3].mxu0 }
 0x1ec   : > { %v803_v31 = vadd.f32 %v802_v14, %v762_v27 }
 0x1ed   : > { %v807_v32 = vmax.f32 %v801_v29, 0.0 }
 0x1ee   : > { %v808_v33 = vmax.f32 %v803_v31, 0.0 }
 0x1ef   : > { %v809_v35 = vpack.c.bf16 %v807_v32, %v807_v32 }
 0x1f0   : > { %v810_v34 = vpack.c.bf16 %v808_v33, %v808_v33 }
 0x1f2   : > { %978 = vmatprep.mubr.bf16.mxu1 %v810_v34 }
 0x1f3   : > { %979 = vmatmul.mubr.bf16.vlgmr.msra.gmra.mrb[4].mxu1 %v809_v35 }
 0x2c6   : > { %v1272_v36 = vpop.f32.mrb[4].mxu1 }
 0x2c7   : > { %v1273_v37 = vpop.f32.mrb[5].mxu1 }
 0x2c8   : > { %v1274_v39 = vadd.f32 %v1273_v37, %v1272_v36  ;;  %v1275_v40 = vpop.f32.mrb[6].mxu1 }
 0x2c9   : > { %v1276_v41 = vpop.f32.mrb[7].mxu1 }
 0x2ca   : > { %v981_v42 = vadd.f32 %v1274_v39, %v1231_v38 }
 0x2cc   : > { %v986_v43 = vadd.f32 %v981_v42, %v2090_v2  ;;  %v1248_v2 = vld [vmem:[%s2227_s17] ss:$0 sm:$0xff] }
 0x2ce   : > { %987 = vadd.xlane.f32.xlu0 %v986_v43 }
 0x35b   : > { %v988_v44 = vpop.xlane.xlu0 %987 }
 0x35c   : > { %v990_v45 = vmul.f32 0.0078125, %v988_v44 }
 0x35e   : > { %v991_v46 = vsub.f32 %v986_v43, %v990_v45 }
 0x360   : > { %v992_v47 = vmul.f32 %v991_v46, %v991_v46 }
 0x362   : > { %993 = vadd.xlane.f32.xlu0 %v992_v47 }
 0x3ef   : > { %v994_v48 = vpop.xlane.xlu0 %993 }
 0x3f0   : > { %v995_v49 = vmul.f32 0.0078125, %v994_v48 }
 0x3f2   : > { %v996_v50 = vadd.f32 1e-05, %v995_v49 }
 0x3f4   : > { %1492 = vrsqrt.f32 %v996_v50 }
 0x3fe   : > { %v1493_v51 = vpop.eup %1492 }
 0x3ff   : > { %v998_v52 = vmul.f32 %v1493_v51, %v991_v46 }
 0x401   : > { %v1006_v54 = vmul.f32 %v1248_v2, %v998_v52 }
 0x403   : > { %v1014_v55 = vadd.f32 %v1249_v53, %v1006_v54 }
 0x405   : > { %1015 = vst [vmem:[%s2061_s24] sm:$0xff] %v1014_v55 }
 0x406   : > { %1650 = shalt.err (!%p1647_p8)
}
 0x407   : > { %s1651_s25 = scalar_lea.hbm %s2120_s9, 128  ;;  %s1655_s19 = scalar_lea.hbm %s2229_s18, 768 }
 0x408   : > { %p1652_p12 = scmp.ne.s32.totalorder %s2120_s9, %s1651_s25  ;;  %p1656_p1 = scmp.lt.u32.totalorder %s2120_s9, %s2229_s18 }
 0x409   : > { %p1657_p9 = scmp.lt.u32.totalorder %s1655_s19, %s1651_s25  ;;  %p1659_p2 = scmp.lt.u32.totalorder %s1651_s25, %s2120_s9 }
 0x40a   : > { %p1653_p11 = pnand %p1652_p12, %p2230_p7 }
 0x40b   : > { %p1658_p6 = por %p1657_p9, %p1656_p1 }
 0x40c   : > { %p1654_p5 = pneg %p1653_p11 }
 0x40d   : > { %p1660_p0 = por %p1659_p2, %p1658_p6 }
 0x40f   : > { %p1661_p10 = pnand %p1660_p0, %p1654_p5 }
 0x411   : > { %1664 = shalt.err (!%p1661_p10)
}
 0x412   : > { %1302 = dma.vmem_to_hbm [thread:$0]  (%p2230_p7), %s2122_s14, 128, %s2120_s9, %s1017_s30  }
 0x413 PF: > { %s2231_s26 = sld [smem:[#allocation22_spill]]  ;;  %s2232_s4 = sld [smem:[#allocation23_spill]] }
 0x414   : > { %p1328_p4 = scmp.ge.s32.totalorder %s1747_s12, 2 }
 0x419   : > { %s1044_s8 = sand.u32 1, %s2231_s26   ;;  %p2233_p13 = scmp.ne.s32.totalorder %s2232_s4, 0 }
 0x41a   : > { %s1045_s15 = scalar_lea.sflag [#allocation6], %s1044_s8 }
 0x41b   : > { %p1316_p3 = pnand %p1328_p4, %p2233_p13 }
 0x41d   : > { %1714 = dma.done.wait (!%p1316_p3), %s1045_s15, 128  }
 0x41e   : > { %1716 = vsyncadd (!%p1316_p3), %s1045_s15, 4294967168  ;;  %s25_s12 = sadd.s32 1, %s1747_s12   ;;  %s2234_s2 = sld [smem:[#allocation24_spill]] }
 0x41f   : > { %p22_p8 = scmp.ge.s32.totalorder %s25_s12, 8   ;;  %s2235_s14 = smov %s2248_s27 }
 0x420   : > { %s2236_s27 = smov %s1723_s28  ;;  %s2237_s28 = smov %s1727_s29 }
 0x421   : > { %s2238_s29 = smov %s1964_s16  ;;  %s2239_s30 = smov %s1739_s10 }
 0x422   : > { %s2240_s9 = smov %s1743_s11  ;;  %s2242_s11 = smov %s2235_s14 }
 0x423   :  { %24 = sbr.rel (!%p22_p8) target bundleno = 14 (0xe), region = 139 }
 0x424   : > { %s2241_s10 = smov %s2234_s2 }
 0x42a   :  { %1050 = vsyncpa [#allocation5], 1 }
 0x42b   :  { %1052 = vsyncpa [#allocation5 + $0x1], 1 }
 0x42c   :  { %1053 = vsyncpa [#allocation8], 1 }
 0x42d   :  { %1054 = vsyncpa [#allocation6], 1 }
 0x42e   :  { %1056 = vsyncpa [#allocation6 + $0x1], 1 }
 0x42f   :  { %1057 = vsyncmov [#allocation3] }
 0x432   :  { %s1058_s23 = vpop.sfrf %1057 }
 0x433   :  { %p1254_p7 = scmp.ne.s32.totalorder %s1058_s23, 0 }
 0x435   :  { %1062 = shalt.err (%p1254_p7)  }
 0x436   :  { %1064 = vsyncmov [#allocation3 + $0x1] }
 0x439   :  { %s1065_s16 = vpop.sfrf %1064 }
 0x43a   :  { %p1255_p12 = scmp.ne.s32.totalorder %s1065_s16, 0 }
 0x43c   :  { %1069 = shalt.err (%p1255_p12)  }

</bundles_post_ra>
